<compile_context>
chip_gen: v7x
topology: tpu7x:2x2x1
jax: 0.10.0
libtpu: 0.0.40
codegen_flags: <defaults>
</compile_context>

<pallas_src>
import functools

import jax
import jax.numpy as jnp
import numpy as np
from jax.experimental import pallas as pl
from jax.experimental.pallas import tpu as pltpu


def _layernorm(v, g, b, eps=1e-5):
    mu = jnp.mean(v, axis=-1, keepdims=True)
    var = jnp.mean((v - mu) ** 2, axis=-1, keepdims=True)
    return (v - mu) * jax.lax.rsqrt(var + eps) * g + b


# ----------------------------------------------------------------------------
# Kernel 1: LayerNorm1 + QKV projection (q pre-scaled), outputs bf16 q, k, v.
# ----------------------------------------------------------------------------
def ln_qkv_kernel(x_ref, g1_ref, b1_ref, wqkv_ref, q_ref, k_ref, v_ref, *, scale):
    x = x_ref[0]                                        # (tq, C) f32
    C = x.shape[-1]
    xn = _layernorm(x, g1_ref[...], b1_ref[...]).astype(jnp.bfloat16)
    qkv = jnp.dot(xn, wqkv_ref[...],
                  preferred_element_type=jnp.float32)   # (tq, 3C) f32 acc
    q_ref[0] = (qkv[:, 0 * C:1 * C] * scale).astype(jnp.bfloat16)
    k_ref[0] = qkv[:, 1 * C:2 * C].astype(jnp.bfloat16)
    v_ref[0] = qkv[:, 2 * C:3 * C].astype(jnp.bfloat16)


# ----------------------------------------------------------------------------
# Kernel 2: attention (query-tiled, full K/V) + proj + residual + MLP + residual
# ----------------------------------------------------------------------------
def attn_mlp_kernel(x_ref, q_ref, k_ref, v_ref, wproj_ref, bproj_ref,
                    g2_ref, b2_ref, w1_ref, bm1_ref, w2_ref, bm2_ref,
                    o_ref, *, num_heads):
    x = x_ref[0]            # (tq, C) f32 residual input
    qb = q_ref[0]           # (tq, C) bf16, already scaled by head_dim**-0.5
    kb = k_ref[0]           # (N, C)  bf16
    vb = v_ref[0]           # (N, C)  bf16
    tq, C = x.shape
    hd = C // num_heads

    # Per-head accumulation straight into the projection output (no concat,
    # no per-head output buffer).  Static Python loop -> fully unrolled.
    acc = jnp.zeros((tq, C), jnp.float32)
    for h in range(num_heads):
        sl = slice(h * hd, (h + 1) * hd)
        qh = qb[:, sl]                          # (tq, hd) bf16
        kh = kb[:, sl]                          # (N, hd)  bf16
        vh = vb[:, sl]                          # (N, hd)  bf16
        # q @ k^T without an explicit transpose: contract last dims.
        s = jax.lax.dot_general(qh, kh, (((1,), (1,)), ((), ())),
                                preferred_element_type=jnp.float32)   # (tq, N)
        s = s - jnp.max(s, axis=-1, keepdims=True)
        p = jnp.exp(s)
        p = p * pl.reciprocal(jnp.sum(p, axis=-1, keepdims=True), approx=True)
        oh = jnp.dot(p.astype(jnp.bfloat16), vh,
                     preferred_element_type=jnp.float32)               # (tq, hd)
        acc = acc + jnp.dot(oh.astype(jnp.bfloat16), wproj_ref[sl, :],
                            preferred_element_type=jnp.float32)        # (tq, C)

    x1 = x + acc + bproj_ref[...]                                      # f32

    # MLP branch (fused with LN2, exact erf GELU = nn.GELU default).
    xn2 = _layernorm(x1, g2_ref[...], b2_ref[...])
    h1 = jnp.dot(xn2.astype(jnp.bfloat16), w1_ref[...],
                 preferred_element_type=jnp.float32) + bm1_ref[...]
    h1 = jax.nn.gelu(h1, approximate=False)
    y = jnp.dot(h1.astype(jnp.bfloat16), w2_ref[...],
                preferred_element_type=jnp.float32) + bm2_ref[...]

    o_ref[0] = (x1 + y).astype(o_ref.dtype)


# ----------------------------------------------------------------------------
# Wrapper
# ----------------------------------------------------------------------------
_VMEM_LIMIT = 64 * 1024 * 1024   # explicit scoped-VMEM budget (<= v7x physical)


def _pick_query_tile(N):
    """Largest 128-multiple tile dividing N, else the full sequence."""
    for t in (512, 256, 128):
        if N % t == 0:
            return t
    return N


def vit_block(x, params, *, num_heads):
    B, N, C = x.shape
    H = params["w1"].shape[1]
    hd = C // num_heads
    scale = hd ** (-0.5)
    bf16 = jnp.bfloat16

    tq = _pick_query_tile(N)
    n_q = N // tq

    # Cast weight matrices to bf16 once (biases / LN params stay f32).
    wqkv = params["wqkv"].astype(bf16)
    wproj = params["wproj"].astype(bf16)
    w1 = params["w1"].astype(bf16)
    w2 = params["w2"].astype(bf16)

    def full2d(shape):
        # Constant block index -> fetched once, resident for the whole grid.
        return pl.BlockSpec(shape, lambda b, t: (0, 0))

    seq_spec = pl.BlockSpec((1, tq, C), lambda b, t: (b, t, 0))
    kv_spec = pl.BlockSpec((1, N, C), lambda b, t: (b, 0, 0))

    # --- Kernel 1: LN1 + QKV (q pre-scaled) ---
    q, k, v = pl.pallas_call(
        functools.partial(ln_qkv_kernel, scale=scale),
        out_shape=tuple(jax.ShapeDtypeStruct((B, N, C), bf16) for _ in range(3)),
        grid_spec=pltpu.PrefetchScalarGridSpec(
            num_scalar_prefetch=0,
            grid=(B, n_q),
            in_specs=[
                seq_spec,               # x
                full2d((1, C)),         # gamma1
                full2d((1, C)),         # beta1
                full2d((C, 3 * C)),     # W_qkv (bf16, in x out)
            ],
            out_specs=(seq_spec, seq_spec, seq_spec),
        ),
        compiler_params=pltpu.CompilerParams(
            dimension_semantics=("parallel", "parallel"),
            vmem_limit_bytes=_VMEM_LIMIT),
    )(x, params["g1"], params["b1"], wqkv)

    # --- Kernel 2: attention + proj + residual + LN2 + MLP + residual ---
    out = pl.pallas_call(
        functools.partial(attn_mlp_kernel, num_heads=num_heads),
        out_shape=jax.ShapeDtypeStruct((B, N, C), x.dtype),
        grid_spec=pltpu.PrefetchScalarGridSpec(
            num_scalar_prefetch=0,
            grid=(B, n_q),
            in_specs=[
                seq_spec,               # x (f32 residual)
                seq_spec,               # q (bf16, pre-scaled)
                kv_spec,                # k (full sequence)
                kv_spec,                # v (full sequence)
                full2d((C, C)),         # W_proj (bf16)
                full2d((1, C)),         # b_proj
                full2d((1, C)),         # gamma2
                full2d((1, C)),         # beta2
                full2d((C, H)),         # W_fc1 (bf16)
                full2d((1, H)),         # b_fc1
                full2d((H, C)),         # W_fc2 (bf16)
                full2d((1, C)),         # b_fc2
            ],
            out_specs=seq_spec,
        ),
        compiler_params=pltpu.CompilerParams(
            dimension_semantics=("parallel", "parallel"),
            vmem_limit_bytes=_VMEM_LIMIT),
    )(x, q, k, v, wproj, params["bproj"], params["g2"], params["b2"],
      w1, params["bm1"], w2, params["bm2"])
    return out


# ----------------------------------------------------------------------------
# Pure-JAX reference (mirrors the PyTorch forward in eval mode, f32)
# ----------------------------------------------------------------------------
def vit_block_ref(x, params, *, num_heads):
    B, N, C = x.shape
    hd = C // num_heads
    scale = hd ** (-0.5)

    def ln(v, g, b):
        mu = jnp.mean(v, axis=-1, keepdims=True)
        var = jnp.mean((v - mu) ** 2, axis=-1, keepdims=True)
        return (v - mu) / jnp.sqrt(var + 1e-5) * g + b

    xn = ln(x, params["g1"], params["b1"])
    qkv = xn @ params["wqkv"]                                   # (B, N, 3C)
    qkv = qkv.reshape(B, N, 3, num_heads, hd).transpose(2, 0, 3, 1, 4)
    q, k, v = qkv[0], qkv[1], qkv[2]                            # (B, H, N, hd)
    attn = jnp.einsum("bhnd,bhmd->bhnm", q, k) * scale
    attn = jax.nn.softmax(attn, axis=-1)
    out = jnp.einsum("bhnm,bhmd->bhnd", attn, v)
    out = out.transpose(0, 2, 1, 3).reshape(B, N, C)
    out = out @ params["wproj"] + params["bproj"]
    x1 = x + out

    xn2 = ln(x1, params["g2"], params["b2"])
    h1 = jax.nn.gelu(xn2 @ params["w1"] + params["bm1"], approximate=False)
    y = h1 @ params["w2"] + params["bm2"]
    return x1 + y


def init_params(key, dim, mlp_hidden):
    ks = jax.random.split(key, 6)
    s = 0.05
    return {
        "g1": jnp.ones((1, dim), jnp.float32),
        "b1": jnp.zeros((1, dim), jnp.float32),
        # qkv_bias=False in the module, so no qkv bias.
        "wqkv": s * jax.random.normal(ks[0], (dim, 3 * dim), jnp.float32),
        "wproj": s * jax.random.normal(ks[1], (dim, dim), jnp.float32),
        "bproj": s * jax.random.normal(ks[2], (1, dim), jnp.float32),
        "g2": jnp.ones((1, dim), jnp.float32),
        "b2": jnp.zeros((1, dim), jnp.float32),
        "w1": s * jax.random.normal(ks[3], (dim, mlp_hidden), jnp.float32),
        "bm1": s * jax.random.normal(ks[4], (1, mlp_hidden), jnp.float32),
        "w2": s * jax.random.normal(ks[5], (mlp_hidden, dim), jnp.float32),
        "bm2": jnp.zeros((1, dim), jnp.float32),
    }


if __name__ == "__main__":
    B, N, C = 2, 8, 32
    num_heads = 4
    mlp_ratio = 4.0
    mlp_hidden = int(C * mlp_ratio)

    key = jax.random.PRNGKey(0)
    kx, kp = jax.random.split(key)
    x = jax.random.normal(kx, (B, N, C), jnp.float32)
    params = init_params(kp, C, mlp_hidden)

    out = vit_block(x, params, num_heads=num_heads)
    out = jax.block_until_ready(out)

    ref = vit_block_ref(x, params, num_heads=num_heads)
    # bf16 matmul inputs with f32 accumulation vs. a pure-f32 reference.
    np.testing.assert_allclose(np.asarray(out), np.asarray(ref),
                               rtol=2e-2, atol=2e-2)

    print("KERNEL_OK")
</pallas_src>

<mosaic_0001>
module attributes {stable_mosaic.version = 11 : i64} {
  func.func @ln_qkv_kernel(%arg0: i32, %arg1: i32, %arg2: memref<1x8x32xf32, #tpu.memory_space<vmem>>, %arg3: memref<1x32xf32, #tpu.memory_space<vmem>>, %arg4: memref<1x32xf32, #tpu.memory_space<vmem>>, %arg5: memref<32x96xbf16, #tpu.memory_space<vmem>>, %arg6: memref<1x8x32xbf16, #tpu.memory_space<vmem>>, %arg7: memref<1x8x32xbf16, #tpu.memory_space<vmem>>, %arg8: memref<1x8x32xbf16, #tpu.memory_space<vmem>>) attributes {dimension_semantics = [#tpu.dimension_semantics<parallel>, #tpu.dimension_semantics<parallel>], iteration_bounds = array<i64: 2, 1>, scalar_prefetch = 0 : i64, scratch_operands = 0 : i64, tpu.core_type = #tpu.core_type<tc>, window_params = [{transform_indices = @transform_0, window_bounds = array<i64: 1, 8, 32>}, {pipeline_mode = #tpu.pipeline_mode<synchronous>, transform_indices = @transform_1, window_bounds = array<i64: 1, 32>}, {pipeline_mode = #tpu.pipeline_mode<synchronous>, transform_indices = @transform_2, window_bounds = array<i64: 1, 32>}, {pipeline_mode = #tpu.pipeline_mode<synchronous>, transform_indices = @transform_3, window_bounds = array<i64: 32, 96>}, {transform_indices = @transform_4, window_bounds = array<i64: 1, 8, 32>}, {transform_indices = @transform_5, window_bounds = array<i64: 1, 8, 32>}, {transform_indices = @transform_6, window_bounds = array<i64: 1, 8, 32>}]} {
    %c0 = arith.constant 0 : index
    %c0_0 = arith.constant 0 : index
    %c0_1 = arith.constant 0 : index
    %0 = vector.load %arg2[%c0, %c0_0, %c0_1] : memref<1x8x32xf32, #tpu.memory_space<vmem>>, vector<1x8x32xf32>
    %1 = vector.shape_cast %0 : vector<1x8x32xf32> to vector<8x32xf32>
    %c0_2 = arith.constant 0 : index
    %c0_3 = arith.constant 0 : index
    %2 = vector.load %arg3[%c0_2, %c0_3] : memref<1x32xf32, #tpu.memory_space<vmem>>, vector<1x32xf32>
    %c0_4 = arith.constant 0 : index
    %c0_5 = arith.constant 0 : index
    %3 = vector.load %arg4[%c0_4, %c0_5] : memref<1x32xf32, #tpu.memory_space<vmem>>, vector<1x32xf32>
    %cst = arith.constant dense<0.000000e+00> : vector<8xf32>
    %4 = vector.multi_reduction <add>, %1, %cst [1] : vector<8x32xf32> to vector<8xf32>
    %5 = vector.shape_cast %4 : vector<8xf32> to vector<8x1xf32>
    %cst_6 = arith.constant 3.200000e+01 : f32
    %6 = vector.broadcast %cst_6 : f32 to vector<8x1xf32>
    %7 = arith.divf %5, %6 : vector<8x1xf32>
    %8 = vector.broadcast %7 : vector<8x1xf32> to vector<8x32xf32>
    %9 = arith.subf %1, %8 : vector<8x32xf32>
    %10 = arith.mulf %9, %9 : vector<8x32xf32>
    %cst_7 = arith.constant dense<0.000000e+00> : vector<8xf32>
    %11 = vector.multi_reduction <add>, %10, %cst_7 [1] : vector<8x32xf32> to vector<8xf32>
    %12 = vector.shape_cast %11 : vector<8xf32> to vector<8x1xf32>
    %cst_8 = arith.constant 3.200000e+01 : f32
    %13 = vector.broadcast %cst_8 : f32 to vector<8x1xf32>
    %14 = arith.divf %12, %13 : vector<8x1xf32>
    %15 = vector.broadcast %7 : vector<8x1xf32> to vector<8x32xf32>
    %16 = arith.subf %1, %15 : vector<8x32xf32>
    %cst_9 = arith.constant 9.99999974E-6 : f32
    %17 = vector.broadcast %cst_9 : f32 to vector<8x1xf32>
    %18 = arith.addf %14, %17 : vector<8x1xf32>
    %19 = math.rsqrt %18 : vector<8x1xf32>
    %20 = vector.broadcast %19 : vector<8x1xf32> to vector<8x32xf32>
    %21 = arith.mulf %16, %20 : vector<8x32xf32>
    %22 = vector.broadcast %2 : vector<1x32xf32> to vector<8x32xf32>
    %23 = arith.mulf %21, %22 : vector<8x32xf32>
    %24 = vector.broadcast %3 : vector<1x32xf32> to vector<8x32xf32>
    %25 = arith.addf %23, %24 : vector<8x32xf32>
    %26 = arith.truncf %25 : vector<8x32xf32> to vector<8x32xbf16>
    %c0_10 = arith.constant 0 : index
    %c0_11 = arith.constant 0 : index
    %27 = vector.load %arg5[%c0_10, %c0_11] : memref<32x96xbf16, #tpu.memory_space<vmem>>, vector<32x96xbf16>
    %cst_12 = arith.constant dense<0.000000e+00> : vector<8x96xf32>
    %28 = tpu.matmul %26, %27, %cst_12 {dimension_numbers = #tpu.dot_dimension_numbers<[1], [0], [0], [1], [0, 0, 1, 1], [], []>} : vector<8x32xbf16>, vector<32x96xbf16>, vector<8x96xf32> -> vector<8x96xf32>
    %29 = vector.extract_strided_slice %28 {offsets = [0, 0], sizes = [8, 32], strides = [1, 1]} : vector<8x96xf32> to vector<8x32xf32>
    %cst_13 = arith.constant 0.353553385 : f32
    %30 = vector.broadcast %cst_13 : f32 to vector<8x32xf32>
    %31 = arith.mulf %29, %30 : vector<8x32xf32>
    %32 = arith.truncf %31 : vector<8x32xf32> to vector<8x32xbf16>
    %c0_14 = arith.constant 0 : index
    %c0_15 = arith.constant 0 : index
    %c0_16 = arith.constant 0 : index
    %33 = vector.load %arg6[%c0_14, %c0_15, %c0_16] : memref<1x8x32xbf16, #tpu.memory_space<vmem>>, vector<1x8x32xbf16>
    %34 = vector.shape_cast %33 : vector<1x8x32xbf16> to vector<8x32xbf16>
    %35 = vector.shape_cast %32 : vector<8x32xbf16> to vector<1x8x32xbf16>
    tpu.vector_store %arg6[%c0_14, %c0_15, %c0_16], %35 {strides = array<i32>} : memref<1x8x32xbf16, #tpu.memory_space<vmem>>, vector<1x8x32xbf16>,
    %36 = vector.extract_strided_slice %28 {offsets = [0, 32], sizes = [8, 32], strides = [1, 1]} : vector<8x96xf32> to vector<8x32xf32>
    %37 = arith.truncf %36 : vector<8x32xf32> to vector<8x32xbf16>
    %c0_17 = arith.constant 0 : index
    %c0_18 = arith.constant 0 : index
    %c0_19 = arith.constant 0 : index
    %38 = vector.load %arg7[%c0_17, %c0_18, %c0_19] : memref<1x8x32xbf16, #tpu.memory_space<vmem>>, vector<1x8x32xbf16>
    %39 = vector.shape_cast %38 : vector<1x8x32xbf16> to vector<8x32xbf16>
    %40 = vector.shape_cast %37 : vector<8x32xbf16> to vector<1x8x32xbf16>
    tpu.vector_store %arg7[%c0_17, %c0_18, %c0_19], %40 {strides = array<i32>} : memref<1x8x32xbf16, #tpu.memory_space<vmem>>, vector<1x8x32xbf16>,
    %41 = vector.extract_strided_slice %28 {offsets = [0, 64], sizes = [8, 32], strides = [1, 1]} : vector<8x96xf32> to vector<8x32xf32>
    %42 = arith.truncf %41 : vector<8x32xf32> to vector<8x32xbf16>
    %c0_20 = arith.constant 0 : index
    %c0_21 = arith.constant 0 : index
    %c0_22 = arith.constant 0 : index
    %43 = vector.load %arg8[%c0_20, %c0_21, %c0_22] : memref<1x8x32xbf16, #tpu.memory_space<vmem>>, vector<1x8x32xbf16>
    %44 = vector.shape_cast %43 : vector<1x8x32xbf16> to vector<8x32xbf16>
    %45 = vector.shape_cast %42 : vector<8x32xbf16> to vector<1x8x32xbf16>
    tpu.vector_store %arg8[%c0_20, %c0_21, %c0_22], %45 {strides = array<i32>} : memref<1x8x32xbf16, #tpu.memory_space<vmem>>, vector<1x8x32xbf16>,
    return
  }
  func.func @transform_0(%arg0: i32, %arg1: i32) -> (i32, i32, i32) {
    %c0_i32 = arith.constant 0 : i32
    %c0_i32_0 = arith.constant 0 : i32
    return %arg0, %arg1, %c0_i32 : i32, i32, i32
  }
  func.func @transform_1(%arg0: i32, %arg1: i32) -> (i32, i32) {
    %c0_i32 = arith.constant 0 : i32
    %c0_i32_0 = arith.constant 0 : i32
    %c0_i32_1 = arith.constant 0 : i32
    return %c0_i32, %c0_i32_0 : i32, i32
  }
  func.func @transform_2(%arg0: i32, %arg1: i32) -> (i32, i32) {
    %c0_i32 = arith.constant 0 : i32
    %c0_i32_0 = arith.constant 0 : i32
    %c0_i32_1 = arith.constant 0 : i32
    return %c0_i32, %c0_i32_0 : i32, i32
  }
  func.func @transform_3(%arg0: i32, %arg1: i32) -> (i32, i32) {
    %c0_i32 = arith.constant 0 : i32
    %c0_i32_0 = arith.constant 0 : i32
    %c0_i32_1 = arith.constant 0 : i32
    return %c0_i32, %c0_i32_0 : i32, i32
  }
  func.func @transform_4(%arg0: i32, %arg1: i32) -> (i32, i32, i32) {
    %c0_i32 = arith.constant 0 : i32
    %c0_i32_0 = arith.constant 0 : i32
    return %arg0, %arg1, %c0_i32 : i32, i32, i32
  }
  func.func @transform_5(%arg0: i32, %arg1: i32) -> (i32, i32, i32) {
    %c0_i32 = arith.constant 0 : i32
    %c0_i32_0 = arith.constant 0 : i32
    return %arg0, %arg1, %c0_i32 : i32, i32, i32
  }
  func.func @transform_6(%arg0: i32, %arg1: i32) -> (i32, i32, i32) {
    %c0_i32 = arith.constant 0 : i32
    %c0_i32_0 = arith.constant 0 : i32
    return %arg0, %arg1, %c0_i32 : i32, i32, i32
  }
}

</mosaic_0001>

<bundles_post_ra>
// kernel: tpu_custom_call.1
= control target key start
LH: loop header
LB: loop body
LE: loop exit
PB: predicated region body
PF: predicated region fallthrough
CT: control target
= control target key end

     0   :  { %12 = vsyncpa [#allocation3], 0  ;;  %s1508_s0 = inlined_call_operand.hbm [shape: f32[2,8,32], index: 0, kind: input, shape index: {}]   ;;  %s1509_s1 = inlined_call_operand.hbm [shape: f32[1,32], index: 1, kind: input, shape index: {}]   ;;  %s1510_s2 = inlined_call_operand.hbm [shape: f32[1,32], index: 2, kind: input, shape index: {}]   ;;  %s1511_s3 = inlined_call_operand.hbm [shape: bf16[32,96], index: 3, kind: input, shape index: {}]   ;;  %s1512_s4 = inlined_call_operand.hbm [shape: bf16[2,8,32], index: 4, kind: output, shape index: {0}]   ;;  %s1513_s5 = inlined_call_operand.hbm [shape: bf16[2,8,32], index: 5, kind: output, shape index: {1}]   ;;  %s1514_s6 = inlined_call_operand.hbm [shape: bf16[2,8,32], index: 6, kind: output, shape index: {2}]  }
   0x1   :  { %14 = vsyncpa [#allocation3 + $0x1], 0 }
   0x2   :  { %15 = vsyncpa [#allocation6], 0 }
   0x3   :  { %16 = vsyncpa [#allocation9], 0 }
   0x4   :  { %17 = vsyncpa [#allocation4], 0 }
   0x5   :  { %19 = vsyncpa [#allocation4 + $0x1], 0 }
   0x6   :  { %20 = vsyncpa [#allocation12], 0 }
   0x7   :  { %22 = vsyncpa [#allocation12 + $0x1], 0  ;;  %s1150_s21 = smov 0   ;;  %s1152_s22 = smov 0  }
   0x8   :  { %s1154_s23 = smov 0   ;;  %s1156_s24 = smov 0  }
   0x9   :  { %s1158_s25 = smov 0   ;;  %s1160_s26 = smov 0  }
   0xa LB: > { %s1181_s27 = sadd.s32 4294967295, %s1100_s26   ;;  %s1518_s28 = sadd.s32 4294967294, %s1100_s26   ;;  %s1100_s26 = sphi %s1160_s26, %s28_s26   ;;  %s1096_s25 = sphi %s1158_s25, %s1540_s25   ;;  %s1092_s24 = sphi %s1156_s24, %s1539_s24   ;;  %s1088_s23 = sphi %s1154_s23, %s1538_s23   ;;  %s1084_s22 = sphi %s1152_s22, %s1537_s22   ;;  %s1080_s21 = sphi %s1150_s21, %s1536_s21  }
   0xb   : > { %p62_p0 = scmp.ne.s32.totalorder %s1084_s22, %s1080_s21  ;;  %p1515_p1 = scmp.eq.s32.totalorder %s1181_s27, 0 }
   0xc   : > { %p157_p3 = scmp.eq.s32.totalorder %s1518_s28, 1  ;;  %p682_p5 = scmp.ge.s32.totalorder %s1100_s26, 1 }
   0xd   : > { %p1192_p4 = por %p1515_p1, %p62_p0  ;;  %p220_p7 = scmp.lt.s32.totalorder %s1100_s26, 3 }
   0xe   : > { %p1197_p6 = por %p157_p3, %p62_p0  ;;  %s1102_s8 = smov [#allocation5]  }
   0xf   : > { %s1519_s29 = scalar_select %p1192_p4, 1, 0 }
  0x10   : > { %s1520_s30 = scalar_select %p1197_p6, 1, 0 }
  0x11   : > { %p1202_p8 = pnand %p682_p5, %p220_p7  ;;  %s233_s9 = sshll.u32 %s1102_s8, 4  ;;  %s234_s9 = int_to_ptr.vmem [resolvable:$true] %s233_s9 }
  0x12   : > { %s1103_s10 = smov [#allocation7]   ;;  %s1104_s13 = smov [#allocation8]  }
  0x13   : > { %s1521_s7 = scalar_select %p1202_p8, 1, 0 }
  0x14   : > { %p743_p10 = pneg %p1202_p8  ;;  %s244_s11 = sshll.u32 %s1103_s10, 4  ;;  %s1215_s11 = int_to_ptr.vmem [resolvable:$true] %s244_s11 }
  0x15   : > { %s254_s14 = sshll.u32 %s1104_s13, 4  ;;  %s836_s17 = scalar_lea.hbm %s1509_s1, 16  ;;  %s1217_s14 = int_to_ptr.vmem [resolvable:$true] %s254_s14 }
  0x16   : > { %p1211_p11 = pnand %p743_p10, %p1515_p1  ;;  %p837_p12 = scmp.ne.s32.totalorder %s1509_s1, %s836_s17 }
  0x17   : > { %p843_p5 = scmp.lt.u32.totalorder %s836_s17, %s1509_s1 }
  0x18   : > { %p1227_p13 = pneg %p1211_p11 }
  0x1a   : > { %p839_p0 = pnand %p1227_p13, %p837_p12 }
  0x1c   : > { %p840_p3 = pneg %p839_p0 }
  0x1e   : > { %p845_p7 = pnand %p843_p5, %p840_p3 }
  0x20   : > { %848 = shalt.err (!%p845_p7)
}
  0x21   : > { %s849_s13 = scalar_lea.vmem %s234_s9, 16  ;;  %s856_s15 = scalar_lea.vmem %s234_s9, 32 }
  0x22   : > { %p850_p10 = scmp.ne.s32.totalorder %s234_s9, %s849_s13  ;;  %p857_p2 = scmp.lt.s32.totalorder %s234_s9, %s234_s9 }
  0x23   : > { %p858_p6 = scmp.lt.s32.totalorder %s856_s15, %s849_s13 }
  0x24   : > { %p852_p9 = pnand %p850_p10, %p1227_p13 }
  0x25   : > { %p859_p4 = por %p858_p6, %p857_p2 }
  0x26   : > { %p853_p1 = pneg %p852_p9 }
  0x28   : > { %p860_p8 = pnand %p859_p4, %p853_p1 }
  0x2a   : > { %863 = shalt.err (!%p860_p8)
}
  0x2b   : > { %746 = dma.hbm_to_vmem [thread:$0]  (!%p1211_p11), %s1509_s1, 16, %s234_s9, [#allocation6]  }
  0x2c   : > { %s864_s8 = scalar_lea.hbm %s1510_s2, 16 }
  0x2d   : > { %p865_p9 = scmp.ne.s32.totalorder %s1510_s2, %s864_s8  ;;  %p871_p1 = scmp.lt.u32.totalorder %s864_s8, %s1510_s2 }
  0x2f   : > { %p867_p12 = pnand %p865_p9, %p1227_p13 }
  0x31   : > { %p868_p2 = pneg %p867_p12 }
  0x33   : > { %p873_p4 = pnand %p871_p1, %p868_p2 }
  0x35   : > { %876 = shalt.err (!%p873_p4)
}
  0x36   : > { %s877_s9 = scalar_lea.vmem %s1215_s11, 16  ;;  %s884_s28 = scalar_lea.vmem %s1215_s11, 32 }
  0x37   : > { %p878_p6 = scmp.ne.s32.totalorder %s1215_s11, %s877_s9  ;;  %p885_p3 = scmp.lt.s32.totalorder %s1215_s11, %s1215_s11 }
  0x38   : > { %p886_p5 = scmp.lt.s32.totalorder %s884_s28, %s877_s9 }
  0x39   : > { %p880_p8 = pnand %p878_p6, %p1227_p13 }
  0x3a   : > { %p887_p7 = por %p886_p5, %p885_p3 }
  0x3b   : > { %p881_p0 = pneg %p880_p8 }
  0x3d   : > { %p888_p10 = pnand %p887_p7, %p881_p0 }
  0x3f   : > { %891 = shalt.err (!%p888_p10)
}
  0x40   : > { %749 = dma.hbm_to_vmem [thread:$0]  (!%p1211_p11), %s1510_s2, 16, %s1215_s11, [#allocation6]  }
  0x41   : > { %s892_s8 = scalar_lea.hbm %s1511_s3, 256 }
  0x42   : > { %p893_p9 = scmp.ne.s32.totalorder %s1511_s3, %s892_s8  ;;  %p899_p1 = scmp.lt.u32.totalorder %s892_s8, %s1511_s3 }
  0x44   : > { %p895_p12 = pnand %p893_p9, %p1227_p13 }
  0x46   : > { %p896_p2 = pneg %p895_p12 }
  0x48   : > { %p901_p4 = pnand %p899_p1, %p896_p2 }
  0x4a   : > { %904 = shalt.err (!%p901_p4)
}
  0x4b   : > { %s905_s11 = scalar_lea.vmem %s1217_s14, 256  ;;  %p913_p3 = scmp.lt.s32.totalorder %s1217_s14, %s1217_s14 }
  0x4c   : > { %p906_p6 = scmp.ne.s32.totalorder %s1217_s14, %s905_s11  ;;  %p914_p5 = scmp.lt.s32.totalorder %s905_s11, %s905_s11 }
  0x4e   : > { %p908_p8 = pnand %p906_p6, %p1227_p13  ;;  %p915_p7 = por %p914_p5, %p913_p3 }
  0x50   : > { %p909_p0 = pneg %p908_p8 }
  0x52   : > { %p916_p10 = pnand %p915_p7, %p909_p0 }
  0x54   : > { %919 = shalt.err (!%p916_p10)
}
  0x55   : > { %s1105_s28 = smov 64   ;;  %s1106_s20 = smov 4  }
  0x56   : > { %752 = dma.hbm_to_vmem [thread:$0]  (!%p1211_p11), %s1511_s3, 256, %s1217_s14, [#allocation9], %s1105_s28, %s1105_s28, %s1106_s20  }
  0x57   : > { %s49_s17 = sadd.s32 1, %s1088_s23  ;;  %s40_s19 = sadd.s32 1, %s1096_s25 }
  0x58   : > { %p56_p13 = scmp.ne.s32.totalorder %s1088_s23, %s1084_s22  ;;  %p42_p9 = scmp.ge.s32.totalorder %s40_s19, 2 }
  0x59   : > { %p57_p12 = scmp.eq.s32.totalorder %s1100_s26, 0  ;;  %p1524_p2 = scmp.eq.s32.totalorder %s1181_s27, 1 }
  0x5a   : > { %p770_p4 = scmp.lt.s32.totalorder %s1100_s26, 2  ;;  %s1542_s19 = smov (%p42_p9, %s40_s19), 0 }
  0x5b   : > { %p1297_p1 = por %p1524_p2, %p56_p13  ;;  %p58_p6 = por %p57_p12, %p56_p13 }
  0x5c   : > { %s268_s12 = sand.u32 1, %s1088_s23   ;;  %s44_s10 = ssub.s32 %s1096_s25, %s1542_s19 }
  0x5d   : > { %p47_p8 = scmp.eq.s32.totalorder %s44_s10, 0  ;;  %s687_s14 = sshll.u32 %s268_s12, 3 }
  0x5e   : > { %s688_s13 = sshll.u32 %s1096_s25, 7  ;;  %s272_s20 = scalar_lea.vmem [#allocation2], %s687_s14 }
  0x5f   : > { %s1309_s15 = scalar_select %p47_p8, %s1088_s23, %s49_s17  }
  0x60   : > { %s1314_s28 = scalar_lea.hbm %s1508_s0, %s688_s13  ;;  %s280_s16 = sshll.u32 %s272_s20, 4  ;;  %s1316_s16 = int_to_ptr.vmem [resolvable:$true] %s280_s16 }
  0x61   : > { %p1320_p11 = pnand %p770_p4, %p58_p6  ;;  %s269_s17 = scalar_lea.sflag [#allocation3], %s268_s12 }
  0x62   : > { %s920_s10 = scalar_lea.hbm %s1314_s28, 128  ;;  %s925_s9 = scalar_lea.hbm %s1508_s0, 256 }
  0x63   : > { %p921_p0 = scmp.ne.s32.totalorder %s1314_s28, %s920_s10  ;;  %p922_p3 = pneg %p1320_p11 }
  0x64   : > { %p926_p10 = scmp.lt.u32.totalorder %s1314_s28, %s1508_s0  ;;  %p927_p13 = scmp.lt.u32.totalorder %s925_s9, %s920_s10 }
  0x65   : > { %p923_p5 = pnand %p922_p3, %p921_p0  ;;  %p929_p12 = scmp.lt.u32.totalorder %s920_s10, %s1314_s28 }
  0x66   : > { %p928_p9 = por %p927_p13, %p926_p10 }
  0x67   : > { %p924_p7 = pneg %p923_p5 }
  0x68   : > { %p930_p2 = por %p929_p12, %p928_p9 }
  0x6a   : > { %p931_p4 = pnand %p930_p2, %p924_p7 }
  0x6c   : > { %934 = shalt.err (!%p931_p4)
}
  0x6d   : > { %s935_s12 = scalar_lea.vmem %s1316_s16, 128  ;;  %s1107_s14 = smov [#allocation2]  }
  0x6e   : > { %p936_p6 = scmp.ne.s32.totalorder %s1316_s16, %s935_s12  ;;  %s940_s13 = sshll.u32 %s1107_s14, 4  ;;  %s941_s13 = int_to_ptr.vmem [resolvable:$false] %s940_s13 }
  0x6f   : > { %s942_s11 = scalar_lea.vmem %s941_s13, 256  ;;  %p943_p5 = scmp.lt.s32.totalorder %s1316_s16, %s941_s13 }
  0x70   : > { %p938_p8 = pnand %p936_p6, %p922_p3  ;;  %p944_p10 = scmp.lt.s32.totalorder %s942_s11, %s935_s12 }
  0x72   : > { %p939_p0 = pneg %p938_p8  ;;  %p945_p13 = por %p944_p10, %p943_p5 }
  0x74   : > { %p946_p9 = pnand %p945_p13, %p939_p0 }
  0x76   : > { %949 = shalt.err (!%p946_p9)
}
  0x77   : > { %756 = dma.hbm_to_vmem [thread:$0]  (!%p1320_p11), %s1314_s28, 128, %s1316_s16, %s269_s17  }
  0x78   : > { %p1527_p7 = scmp.ne.s32.totalorder %s1521_s7, 0 }
  0x79   : > { %s1352_s10 = sand.u32 (!%p1527_p7), 1, %s1084_s22   ;;  %p1528_p3 = scmp.ne.s32.totalorder (!%p1527_p7), %s1519_s29, 0 }
  0x7a   : > { %289 = sbr.rel (%p1527_p7) target bundleno = 819 (0x333), region = 36  ;;  %s690_s9 = sshll.u32 (!%p1527_p7), %s1352_s10, 3 }
  0x7b   : > { %s292_s20 = scalar_lea.sflag (!%p1527_p7), [#allocation3], %s1352_s10  ;;  %s295_s12 = scalar_lea.vmem (!%p1527_p7), [#allocation2], %s690_s9 }
  0x81   : > { %1059 = dma.done.wait (%p1528_p3), %s292_s20, 128  }
  0x82   : > { %1061 = vsyncadd (%p1528_p3), %s292_s20, 4294967168  ;;  %p1529_p12 = scmp.eq.s32.totalorder %s1181_s27, 0 }
  0x84   : > { %1063 = dma.done.wait (%p1529_p12), [#allocation6], 32   ;;  %p1530_p11 = pmov %p1529_p12 }
  0x86   : > { %1065 = vsyncadd (%p1530_p11), [#allocation6], 4294967264  ;;  %p1531_p2 = pmov %p1530_p11 }
  0x88   : > { %1067 = dma.done.wait (%p1531_p2), [#allocation9], 256   ;;  %p1532_p4 = pmov %p1531_p2 }
  0x89   : > { %vm350_vm0 = vcmask 261120   ;;  %v347_v0 = vld [vmem:[%s295_s12] sm:$0xff]  ;;  %v832_v7 = vld [vmem:[#allocation8] sm:$0xff]   ;;  %v1108_v8 = vmov 0.0   ;;  %vm1109_vm1 = vmmov 0   ;;  %s1372_s29 = sshll.u32 %s1352_s10, 2 }
  0x8a   : > { %1069 = vsyncadd (%p1532_p4), [#allocation9], 4294967040  ;;  %v351_v1 = vsel %vm350_vm0, %v347_v0, 0.0  ;;  %715 = vmatprep.subr.bf16.mxu0 %v1108_v8  ;;  %v833_v9 = vld [vmem:[#allocation8 + $0x8] sm:$0xff]   ;;  %719 = vmatprep.mubr.msk.bf16.mxu0 %vm1109_vm1, %v1108_v8  ;;  %v697_v14 = vld [vmem:[#allocation5] ss:$0 sm:$0xff] }
  0x8b   : > { %352 = vadd.xlane.f32.xlu0 %v351_v1  ;;  %716 = vmatpush3.bf16.msra.mxu0 %v832_v7  ;;  %v698_v16 = vld [vmem:[#allocation7] ss:$0 sm:$0xff]  ;;  %s1375_s7 = sshll.u32 %s1092_s24, 6  ;;  %s331_s28 = scalar_lea.vmem [#allocation10], %s1372_s29  ;;  %vm441_vm2 = vcmask 257024  }
  0x8c   : > { %717 = vmatprep.subr.bf16.mxu0 %v1108_v8  ;;  %s480_s16 = sshll.u32 %s331_s28, 4  ;;  %s1110_s18 = smov 96   ;;  %s1384_s16 = int_to_ptr.vmem [resolvable:$true] %s480_s16 }
  0x8d   : > { %s1382_s13 = scalar_lea.hbm %s1512_s4, %s1375_s7  ;;  %s456_s24 = scalar_lea.sflag [#allocation4], %s1352_s10 }
  0x8e   : > { %s950_s11 = scalar_lea.vmem %s1384_s16, 64  ;;  %s1111_s9 = smov [#allocation10]  }
  0x8f   : > { %718 = vmatpush3.bf16.msra.mxu0 %v833_v9  ;;  %p951_p6 = scmp.ne.s32.totalorder %s1384_s16, %s950_s11  ;;  %s954_s20 = sshll.u32 %s1111_s9, 4  ;;  %s955_s20 = int_to_ptr.vmem [resolvable:$false] %s954_s20 }
  0x90   : > { %s956_s12 = scalar_lea.vmem %s955_s20, 128  ;;  %p957_p5 = scmp.lt.s32.totalorder %s1384_s16, %s955_s20 }
  0x91   : > { %p952_p8 = pnand %p951_p6, %p1297_p1  ;;  %p958_p10 = scmp.lt.s32.totalorder %s956_s12, %s950_s11 }
  0x93   : > { %p953_p0 = pneg %p952_p8  ;;  %p959_p13 = por %p958_p10, %p957_p5 }
  0x95   : > { %p960_p9 = pnand %p959_p13, %p953_p0 }
 0x118   : > { %v353_v2 = vpop.xlane.xlu0 %352 }
 0x119   : > { %v355_v3 = vmul.f32 0.03125, %v353_v2 }
 0x11b   : > { %v356_v4 = vsub.f32 %v347_v0, %v355_v3 }
 0x11d   : > { %v357_v5 = vmul.f32 %v356_v4, %v356_v4 }
 0x11f   : > { %v358_v6 = vsel %vm350_vm0, %v357_v5, 0.0 }
 0x120   : > { %359 = vadd.xlane.f32.xlu0 %v358_v6 }
 0x1ad   : > { %v360_v10 = vpop.xlane.xlu0 %359 }
 0x1ae   : > { %v361_v11 = vmul.f32 0.03125, %v360_v10 }
 0x1b0   : > { %v362_v12 = vadd.f32 1e-05, %v361_v11 }
 0x1b2   : > { %834 = vrsqrt.f32 %v362_v12 }
 0x1bc   : > { %v835_v13 = vpop.eup %834 }
 0x1bd   : > { %v364_v15 = vmul.f32 %v835_v13, %v356_v4 }
 0x1bf   : > { %v371_v17 = vmul.f32 %v697_v14, %v364_v15 }
 0x1c1   : > { %v378_v18 = vadd.f32 %v698_v16, %v371_v17 }
 0x1c3   : > { %v379_v19 = vpack.c.bf16 %v378_v18, %v378_v18 }
 0x1c5   : > { %720 = vmatmul.mubr.msk.bf16.vlgmr.msra.gmra.mrb[0].mxu0 %vm350_vm0, %v379_v19 }
 0x298   : > { %v433_v20 = vpop.f32.mrb[0].mxu0 }
 0x299   : > { %v439_v21 = vmul.f32 0.35355338, %v433_v20  ;;  %v721_v22 = vpop.f32.mrb[1].mxu0  ;;  %v711_v23 = vpack.c.bf16 %v433_v20, %v433_v20 }
 0x29a   : > { %v436_v24 = vpop.f32.mrb[2].mxu0 }
 0x29b   : > { %v440_v25 = vpack.c.bf16 %v439_v21, %v439_v21  ;;  %447 = vrot.lane.b32.xlu1 %v711_v23, %s1110_s18  ;;  %v722_v26 = vpop.f32.mrb[3].mxu0 }
 0x29d   : > { %442 = vst.msk [vmem:[%s331_s28] sm:$0xf] %vm441_vm2, %v440_v25 }
 0x29e   : > { %963 = shalt.err (!%p960_p9)
}
 0x29f   : > { %s964_s10 = scalar_lea.hbm %s1382_s13, 64  ;;  %s968_s17 = scalar_lea.hbm %s1512_s4, 128 }
 0x2a0   : > { %p965_p7 = scmp.ne.s32.totalorder %s1382_s13, %s964_s10  ;;  %p969_p11 = scmp.lt.u32.totalorder %s1382_s13, %s1512_s4 }
 0x2a1   : > { %p970_p2 = scmp.lt.u32.totalorder %s968_s17, %s964_s10  ;;  %p972_p6 = scmp.lt.u32.totalorder %s964_s10, %s1382_s13 }
 0x2a2   : > { %p966_p3 = pnand %p965_p7, %p1297_p1 }
 0x2a3   : > { %p971_p4 = por %p970_p2, %p969_p11 }
 0x2a4   : > { %p967_p12 = pneg %p966_p3 }
 0x2a5   : > { %p973_p8 = por %p972_p6, %p971_p4 }
 0x2a7   : > { %p974_p0 = pnand %p973_p8, %p967_p12 }
 0x2a9   : > { %977 = shalt.err (!%p974_p0)
}
 0x2aa   : > { %737 = dma.vmem_to_hbm [thread:$0]  (%p1297_p1), %s1384_s16, 64, %s1382_s13, %s456_s24  }
 0x2ab   : > { %s1112_s11 = smov 64   ;;  %s460_s20 = sand.u32 1, %s1181_s27  }
 0x2ac   : > { %451 = vrot.lane.b32.xlu1 %v711_v23, %s1112_s11  ;;  %s338_s12 = scalar_lea.vmem [#allocation11], %s1372_s29  ;;  %s1415_s17 = scalar_lea.hbm %s1513_s5, %s1375_s7 }
 0x2ad   : > { %s494_s28 = sshll.u32 %s338_s12, 4  ;;  %s345_s14 = scalar_lea.vmem [#allocation13], %s1372_s29  ;;  %s1417_s28 = int_to_ptr.vmem [resolvable:$true] %s494_s28 }
 0x2ae   : > { %s1422_s9 = sshll.u32 %s345_s14, 4  ;;  %s1425_s27 = scalar_lea.sflag [#allocation12], %s460_s20  ;;  %s1456_s9 = int_to_ptr.vmem [resolvable:$true] %s1422_s9 }
 0x2af   : > { %s978_s16 = scalar_lea.vmem %s1417_s28, 64  ;;  %s1113_s13 = smov [#allocation11]  }
 0x2b0   : > { %p979_p5 = scmp.ne.s32.totalorder %s1417_s28, %s978_s16  ;;  %s982_s24 = sshll.u32 %s1113_s13, 4  ;;  %s983_s24 = int_to_ptr.vmem [resolvable:$false] %s982_s24 }
 0x2b1   : > { %s984_s11 = scalar_lea.vmem %s983_s24, 128  ;;  %p985_p9 = scmp.lt.s32.totalorder %s1417_s28, %s983_s24 }
 0x2b2   : > { %p980_p10 = pnand %p979_p5, %p1297_p1  ;;  %p986_p7 = scmp.lt.s32.totalorder %s984_s11, %s978_s16 }
 0x2b4   : > { %p981_p13 = pneg %p980_p10  ;;  %p987_p3 = por %p986_p7, %p985_p9 }
 0x2b6   : > { %p988_p12 = pnand %p987_p3, %p981_p13 }
 0x30d   : > { %v448_v27 = vpop.permute.xlu1 %447 }
 0x30e   : > { %450 = vst.msk [vmem:[%s338_s12] sm:$0xf] %vm441_vm2, %v448_v27 }
 0x30f   : > { %991 = shalt.err (!%p988_p12)
}
 0x310   : > { %s992_s20 = scalar_lea.hbm %s1415_s17, 64  ;;  %s996_s18 = scalar_lea.hbm %s1513_s5, 128 }
 0x311   : > { %p993_p11 = scmp.ne.s32.totalorder %s1415_s17, %s992_s20  ;;  %p997_p6 = scmp.lt.u32.totalorder %s1415_s17, %s1513_s5 }
 0x312   : > { %p998_p8 = scmp.lt.u32.totalorder %s996_s18, %s992_s20  ;;  %p1000_p5 = scmp.lt.u32.totalorder %s992_s20, %s1415_s17 }
 0x313   : > { %p994_p2 = pnand %p993_p11, %p1297_p1 }
 0x314   : > { %p999_p0 = por %p998_p8, %p997_p6 }
 0x315   : > { %p995_p4 = pneg %p994_p2 }
 0x316   : > { %p1001_p10 = por %p1000_p5, %p999_p0 }
 0x318   : > { %p1002_p13 = pnand %p1001_p10, %p995_p4 }
 0x31a   : > { %1005 = shalt.err (!%p1002_p13)
}
 0x31b   : > { %738 = dma.vmem_to_hbm [thread:$0]  (%p1297_p1), %s1417_s28, 64, %s1415_s17, %s1425_s27  }
 0x31c   : > { %s1453_s12 = scalar_lea.hbm %s1514_s6, %s1375_s7  ;;  %s1006_s20 = scalar_lea.vmem %s1456_s9, 64 }
 0x31d   : > { %p1007_p9 = scmp.ne.s32.totalorder %s1456_s9, %s1006_s20  ;;  %s1114_s28 = smov [#allocation13]  }
 0x31e   : > { %v452_v28 = vpop.permute.xlu1 %451  ;;  %s1010_s17 = sshll.u32 %s1114_s28, 4  ;;  %s1011_s17 = int_to_ptr.vmem [resolvable:$false] %s1010_s17 }
 0x31f   : > { %454 = vst.msk [vmem:[%s345_s14] sm:$0xf] %vm441_vm2, %v452_v28  ;;  %p1008_p7 = pnand %p1007_p9, %p1297_p1  ;;  %s1012_s10 = scalar_lea.vmem %s1011_s17, 128 }
 0x320   : > { %p1013_p12 = scmp.lt.s32.totalorder %s1456_s9, %s1011_s17  ;;  %p1014_p11 = scmp.lt.s32.totalorder %s1012_s10, %s1006_s20 }
 0x321   : > { %p1009_p3 = pneg %p1008_p7 }
 0x322   : > { %p1015_p2 = por %p1014_p11, %p1013_p12 }
 0x324   : > { %p1016_p4 = pnand %p1015_p2, %p1009_p3 }
 0x326   : > { %1019 = shalt.err (!%p1016_p4)
}
 0x327   : > { %s1020_s29 = scalar_lea.hbm %s1453_s12, 64  ;;  %s1024_s18 = scalar_lea.hbm %s1514_s6, 128 }
 0x328   : > { %p1021_p6 = scmp.ne.s32.totalorder %s1453_s12, %s1020_s29  ;;  %p1025_p5 = scmp.lt.u32.totalorder %s1453_s12, %s1514_s6 }
 0x329   : > { %p1026_p10 = scmp.lt.u32.totalorder %s1024_s18, %s1020_s29  ;;  %p1028_p9 = scmp.lt.u32.totalorder %s1020_s29, %s1453_s12 }
 0x32a   : > { %p1022_p8 = pnand %p1021_p6, %p1297_p1 }
 0x32b   : > { %p1027_p13 = por %p1026_p10, %p1025_p5 }
 0x32c   : > { %p1023_p0 = pneg %p1022_p8 }
 0x32d   : > { %p1029_p7 = por %p1028_p9, %p1027_p13 }
 0x32f   : > { %p1030_p3 = pnand %p1029_p7, %p1023_p0 }
 0x331   : > { %1033 = shalt.err (!%p1030_p3)
}
 0x332   : > { %739 = dma.vmem_to_hbm [thread:$0]  (%p1297_p1), %s1456_s9, 64, %s1453_s12, %s1425_s27  }
 0x333 PF: > { %s520_s16 = sand.u32 1, %s1080_s21   ;;  %p1533_p12 = scmp.ne.s32.totalorder %s1520_s30, 0 }
 0x334   : > { %p1534_p11 = scmp.ge.s32.totalorder %s1100_s26, 2  ;;  %s521_s11 = scalar_lea.sflag [#allocation4], %s520_s16 }
 0x336   : > { %p758_p2 = pnand %p1534_p11, %p1533_p12 }
 0x338   : > { %1071 = dma.done.wait (!%p758_p2), %s521_s11, 64  }
 0x339   : > { %1073 = vsyncadd (!%p758_p2), %s521_s11, 4294967232  ;;  %s1535_s20 = sadd.s32 4294967294, %s1100_s26  }
 0x33a   : > { %s529_s28 = sand.u32 1, %s1535_s20  }
 0x33b   : > { %s530_s17 = scalar_lea.sflag [#allocation12], %s529_s28 }
 0x33c   : > { %1075 = dma.done.wait (!%p758_p2), %s530_s17, 128  }
 0x33d   : > { %1077 = vsyncadd (!%p758_p2), %s530_s17, 4294967168  ;;  %s28_s26 = sadd.s32 1, %s1100_s26   ;;  %s1536_s21 = smov %s1084_s22 }
 0x33e   : > { %p25_p1 = scmp.ge.s32.totalorder %s28_s26, 4   ;;  %s1537_s22 = smov %s1088_s23 }
 0x33f   : > { %s1538_s23 = smov %s1309_s15  ;;  %s1539_s24 = smov %s1096_s25 }
 0x340   : > { %s1540_s25 = smov %s1542_s19  ;;  %27 = sbr.rel (!%p25_p1) target bundleno = 10 (0xa), region = 125 }
 0x347   :  { %544 = vsyncpa [#allocation3], 1 }
 0x348   :  { %546 = vsyncpa [#allocation3 + $0x1], 1 }
 0x349   :  { %547 = vsyncpa [#allocation6], 1 }
 0x34a   :  { %548 = vsyncpa [#allocation9], 1 }
 0x34b   :  { %549 = vsyncpa [#allocation4], 1 }
 0x34c   :  { %551 = vsyncpa [#allocation4 + $0x1], 1 }
 0x34d   :  { %552 = vsyncpa [#allocation12], 1 }
 0x34e   :  { %554 = vsyncpa [#allocation12 + $0x1], 1 }

</bundles_post_ra>
